<compile_context>
chip_gen: v5e
topology: v5e:2x2
jax: 0.10.0
libtpu: 0.0.40
codegen_flags: <defaults>
</compile_context>

<pallas_src>
import string

import jax
import jax.numpy as jnp
from jax.experimental import pallas as pl
from jax.experimental.pallas import tpu as pltpu

all_letters = string.ascii_letters + " .,;'"
n_letters = len(all_letters)          # 57
n_hidden = 128
n_output = 18                         # number of categories (classic tutorial value)

OUT_PAD = 128                         # logits padded to one full lane vreg
FUSED_W = n_hidden + OUT_PAD          # 256 fused output lanes: [hidden | logits_padded]
NEG_INF = -1e30                       # padded logits lanes -> exp() == 0 exactly


def letter_to_index(letter):
    return all_letters.find(letter)


def line_to_indices(line):
    return jnp.asarray([letter_to_index(c) for c in line], dtype=jnp.int32)


def line_to_tensor(line):
    # (len(line), 1, n_letters) one-hot, matching lineToTensor in the PyTorch code
    t = jnp.zeros((len(line), 1, n_letters), dtype=jnp.float32)
    for li, letter in enumerate(line):
        t = t.at[li, 0, letter_to_index(letter)].set(1.0)
    return t


# ----------------------------- Pallas kernel --------------------------------
def rnn_seq_kernel(idx_ref, wx_ref, wh_ref, b_ref, h0_ref, out_ref, h_ref):
    """One grid step == one timestep. Hidden state is carried in `h_ref`
    (VMEM-resident output block with a constant index_map)."""
    t = pl.program_id(0)

    @pl.when(t == 0)
    def _init():
        h_ref[...] = h0_ref[...]

    h = h_ref[...]                                  # (1, 128) carried hidden

    # x is one-hot, so x @ W_x is just a row gather of the fused x-weight table.
    x_row = wx_ref[idx_ref[t]]                      # (1, 256)

    # Single fused matmul: cat(x,h) @ [W_ih | W_io_padded] + fused bias.
    fused = (x_row
             + jnp.dot(h, wh_ref[...], preferred_element_type=jnp.float32)
             + b_ref[...])                          # (1, 256)

    # New hidden = lanes [0, 128)   (vreg-aligned slice, free)
    h_ref[...] = fused[:, :n_hidden]

    # Logits = lanes [128, 256); lanes >= n_output carry bias = -1e30 -> exp == 0.
    logits = fused[:, n_hidden:]                    # (1, 128)
    m = jnp.max(logits, axis=-1, keepdims=True)
    shifted = logits - m
    lse = jnp.log(jnp.sum(jnp.exp(shifted), axis=-1, keepdims=True))
    out_ref[0] = shifted - lse                      # lane-dense (1, 128) store


def rnn_sequence(indices, h0, packed):
    """Run the RNN over a whole sequence in a single pallas_call.

    indices: (T,) int32 letter indices.
    h0:      (1, n_hidden) initial hidden state.
    Returns (log_probs (T, n_output), final_hidden (1, n_hidden))."""
    wx, wh, b = packed
    T = int(indices.shape[0])

    grid_spec = pltpu.PrefetchScalarGridSpec(
        num_scalar_prefetch=1,                      # letter indices -> SMEM
        grid=(T,),
        in_specs=[
            pl.BlockSpec(wx.shape, lambda t, idx: (0, 0, 0)),   # resident in VMEM
            pl.BlockSpec(wh.shape, lambda t, idx: (0, 0)),      # resident in VMEM
            pl.BlockSpec(b.shape, lambda t, idx: (0, 0)),       # resident in VMEM
            pl.BlockSpec(h0.shape, lambda t, idx: (0, 0)),      # resident in VMEM
        ],
        out_specs=(
            pl.BlockSpec((1, 1, OUT_PAD), lambda t, idx: (t, 0, 0)),  # per-step logprobs
            pl.BlockSpec((1, n_hidden), lambda t, idx: (0, 0)),       # carried hidden
        ),
    )

    out_padded, h_final = pl.pallas_call(
        rnn_seq_kernel,
        grid_spec=grid_spec,
        out_shape=(jax.ShapeDtypeStruct((T, 1, OUT_PAD), jnp.float32),
                   jax.ShapeDtypeStruct((1, n_hidden), jnp.float32)),
        compiler_params=pltpu.CompilerParams(
            dimension_semantics=("arbitrary",)),    # sequential time dependence
    )(indices, wx, wh, b, h0)

    return out_padded[:, 0, :n_output], h_final


# --------------------------- parameter init / packing ------------------------
def init_params(key, input_size, hidden_size, output_size):
    """Deterministic init mimicking nn.Linear's U(-1/sqrt(fan_in), 1/sqrt(fan_in)).
    Weights are stored transposed: (in_features, out_features)."""
    k1, k2, k3, k4 = jax.random.split(key, 4)
    fan_in = input_size + hidden_size
    bound = 1.0 / float(fan_in) ** 0.5
    w_ih = jax.random.uniform(k1, (fan_in, hidden_size), jnp.float32, -bound, bound)
    b_ih = jax.random.uniform(k2, (hidden_size,), jnp.float32, -bound, bound)
    w_io = jax.random.uniform(k3, (fan_in, output_size), jnp.float32, -bound, bound)
    b_io = jax.random.uniform(k4, (output_size,), jnp.float32, -bound, bound)
    return w_ih, b_ih, w_io, b_io


def pack_params(w_ih, b_ih, w_io, b_io):
    """Pre-pack weights host-side into the fused / padded layout the kernel uses.

    wx: (n_letters, 1, 256)  x-part of both Linears, one gatherable row per letter
    wh: (n_hidden, 256)      hidden-part of both Linears (lane-concatenated)
    b : (1, 256)             fused bias; padded logit lanes set to -1e30
    """
    wx = jnp.zeros((n_letters, 1, FUSED_W), jnp.float32)
    wx = wx.at[:, 0, :n_hidden].set(w_ih[:n_letters])
    wx = wx.at[:, 0, n_hidden:n_hidden + n_output].set(w_io[:n_letters])

    wh = jnp.zeros((n_hidden, FUSED_W), jnp.float32)
    wh = wh.at[:, :n_hidden].set(w_ih[n_letters:])
    wh = wh.at[:, n_hidden:n_hidden + n_output].set(w_io[n_letters:])

    b = jnp.full((1, FUSED_W), NEG_INF, jnp.float32)
    b = b.at[0, :n_hidden].set(b_ih)
    b = b.at[0, n_hidden:n_hidden + n_output].set(b_io)
    return wx, wh, b


# --------------------------- pure-JAX reference -------------------------------
def rnn_forward_ref(x, h, w_ih, b_ih, w_io, b_io):
    combined = jnp.concatenate([x, h], axis=1)
    hidden_new = combined @ w_ih + b_ih
    logits = combined @ w_io + b_io
    log_probs = logits - jax.scipy.special.logsumexp(logits, axis=1, keepdims=True)
    return log_probs, hidden_new


if __name__ == "__main__":
    key = jax.random.PRNGKey(0)
    w_ih, b_ih, w_io, b_io = init_params(key, n_letters, n_hidden, n_output)
    packed = pack_params(w_ih, b_ih, w_io, b_io)

    # deterministic example input: the word 'able'
    line = "able"
    indices = line_to_indices(line)                 # (4,) int32
    onehots = line_to_tensor(line)                  # (4, 1, 57) for the reference
    h0 = jnp.zeros((1, n_hidden), jnp.float32)

    # fused Pallas kernel: whole sequence in one call
    log_probs, h_final = rnn_sequence(indices, h0, packed)
    log_probs = jax.block_until_ready(log_probs)
    h_final = jax.block_until_ready(h_final)

    # pure-JAX per-step reference with the original (unfused) parameters
    h_ref = h0
    outs_ref = []
    for t in range(len(line)):
        o_ref, h_ref = rnn_forward_ref(onehots[t], h_ref, w_ih, b_ih, w_io, b_io)
        outs_ref.append(o_ref)
    outs_ref = jnp.concatenate(outs_ref, axis=0)    # (4, n_output)

    assert log_probs.shape == (len(line), n_output)
    assert h_final.shape == (1, n_hidden)
    assert jnp.allclose(log_probs, outs_ref, atol=5e-5, rtol=1e-5)
    assert jnp.allclose(h_final, h_ref, atol=5e-5, rtol=1e-5)

    print("KERNEL_OK")
</pallas_src>

<mosaic_0001>
module attributes {stable_mosaic.version = 11 : i64} {
  func.func @rnn_seq_kernel(%arg0: i32, %arg1: memref<4xi32, #tpu.memory_space<smem>>, %arg2: memref<57x1x256xf32, #tpu.memory_space<vmem>>, %arg3: memref<128x256xf32, #tpu.memory_space<vmem>>, %arg4: memref<1x256xf32, #tpu.memory_space<vmem>>, %arg5: memref<1x128xf32, #tpu.memory_space<vmem>>, %arg6: memref<1x1x128xf32, #tpu.memory_space<vmem>>, %arg7: memref<1x128xf32, #tpu.memory_space<vmem>>) attributes {dimension_semantics = [#tpu.dimension_semantics<arbitrary>], iteration_bounds = array<i64: 4>, scalar_prefetch = 1 : i64, scratch_operands = 0 : i64, tpu.core_type = #tpu.core_type<tc>, window_params = [{pipeline_mode = #tpu.pipeline_mode<synchronous>, transform_indices = @transform_0, window_bounds = array<i64: 57, 1, 256>}, {pipeline_mode = #tpu.pipeline_mode<synchronous>, transform_indices = @transform_1, window_bounds = array<i64: 128, 256>}, {pipeline_mode = #tpu.pipeline_mode<synchronous>, transform_indices = @transform_2, window_bounds = array<i64: 1, 256>}, {pipeline_mode = #tpu.pipeline_mode<synchronous>, transform_indices = @transform_3, window_bounds = array<i64: 1, 128>}, {transform_indices = @transform_4, window_bounds = array<i64: 1, 1, 128>}, {pipeline_mode = #tpu.pipeline_mode<synchronous>, transform_indices = @transform_5, window_bounds = array<i64: 1, 128>}]} {
    %c0_i32 = arith.constant 0 : i32
    %0 = arith.cmpi eq, %arg0, %c0_i32 : i32
    %1 = arith.extui %0 : i1 to i32
    %c0_i32_0 = arith.constant 0 : i32
    %2 = arith.cmpi ne, %1, %c0_i32_0 : i32
    scf.if %2 {
      %c0_15 = arith.constant 0 : index
      %c0_16 = arith.constant 0 : index
      %30 = vector.load %arg5[%c0_15, %c0_16] : memref<1x128xf32, #tpu.memory_space<vmem>>, vector<1x128xf32>
      %c0_17 = arith.constant 0 : index
      %c0_18 = arith.constant 0 : index
      %31 = vector.load %arg7[%c0_17, %c0_18] : memref<1x128xf32, #tpu.memory_space<vmem>>, vector<1x128xf32>
      tpu.vector_store %arg7[%c0_17, %c0_18], %30 {strides = array<i32>} : memref<1x128xf32, #tpu.memory_space<vmem>>, vector<1x128xf32>,
    } else {
    }
    %c0 = arith.constant 0 : index
    %c0_1 = arith.constant 0 : index
    %3 = vector.load %arg7[%c0, %c0_1] : memref<1x128xf32, #tpu.memory_space<vmem>>, vector<1x128xf32>
    %4 = arith.index_cast %arg0 : i32 to index
    %5 = memref.load %arg1[%4] : memref<4xi32, #tpu.memory_space<smem>>
    %6 = arith.index_cast %5 : i32 to index
    %c0_2 = arith.constant 0 : index
    %c0_3 = arith.constant 0 : index
    %7 = vector.load %arg2[%6, %c0_2, %c0_3] : memref<57x1x256xf32, #tpu.memory_space<vmem>>, vector<1x1x256xf32>
    %8 = vector.shape_cast %7 : vector<1x1x256xf32> to vector<1x256xf32>
    %c0_4 = arith.constant 0 : index
    %c0_5 = arith.constant 0 : index
    %9 = vector.load %arg3[%c0_4, %c0_5] : memref<128x256xf32, #tpu.memory_space<vmem>>, vector<128x256xf32>
    %cst = arith.constant dense<0.000000e+00> : vector<1x256xf32>
    %10 = tpu.matmul %3, %9, %cst {dimension_numbers = #tpu.dot_dimension_numbers<[1], [0], [0], [1], [0, 0, 1, 1], [], []>} : vector<1x128xf32>, vector<128x256xf32>, vector<1x256xf32> -> vector<1x256xf32>
    %11 = arith.addf %8, %10 : vector<1x256xf32>
    %c0_6 = arith.constant 0 : index
    %c0_7 = arith.constant 0 : index
    %12 = vector.load %arg4[%c0_6, %c0_7] : memref<1x256xf32, #tpu.memory_space<vmem>>, vector<1x256xf32>
    %13 = arith.addf %11, %12 : vector<1x256xf32>
    %14 = vector.extract_strided_slice %13 {offsets = [0, 0], sizes = [1, 128], strides = [1, 1]} : vector<1x256xf32> to vector<1x128xf32>
    %c0_8 = arith.constant 0 : index
    %c0_9 = arith.constant 0 : index
    %15 = vector.load %arg7[%c0_8, %c0_9] : memref<1x128xf32, #tpu.memory_space<vmem>>, vector<1x128xf32>
    tpu.vector_store %arg7[%c0_8, %c0_9], %14 {strides = array<i32>} : memref<1x128xf32, #tpu.memory_space<vmem>>, vector<1x128xf32>,
    %16 = vector.extract_strided_slice %13 {offsets = [0, 128], sizes = [1, 128], strides = [1, 1]} : vector<1x256xf32> to vector<1x128xf32>
    %cst_10 = arith.constant dense<0xFF800000> : vector<1xf32>
    %17 = vector.multi_reduction <maximumf>, %16, %cst_10 [1] : vector<1x128xf32> to vector<1xf32>
    %18 = vector.shape_cast %17 : vector<1xf32> to vector<1x1xf32>
    %19 = vector.broadcast %18 : vector<1x1xf32> to vector<1x128xf32>
    %20 = arith.subf %16, %19 : vector<1x128xf32>
    %21 = math.exp %20 : vector<1x128xf32>
    %cst_11 = arith.constant dense<0.000000e+00> : vector<1xf32>
    %22 = vector.multi_reduction <add>, %21, %cst_11 [1] : vector<1x128xf32> to vector<1xf32>
    %23 = vector.shape_cast %22 : vector<1xf32> to vector<1x1xf32>
    %24 = math.log %23 : vector<1x1xf32>
    %25 = vector.broadcast %24 : vector<1x1xf32> to vector<1x128xf32>
    %26 = arith.subf %20, %25 : vector<1x128xf32>
    %c0_12 = arith.constant 0 : index
    %c0_13 = arith.constant 0 : index
    %c0_14 = arith.constant 0 : index
    %27 = vector.load %arg6[%c0_12, %c0_13, %c0_14] : memref<1x1x128xf32, #tpu.memory_space<vmem>>, vector<1x1x128xf32>
    %28 = vector.shape_cast %27 : vector<1x1x128xf32> to vector<1x128xf32>
    %29 = vector.shape_cast %26 : vector<1x128xf32> to vector<1x1x128xf32>
    tpu.vector_store %arg6[%c0_12, %c0_13, %c0_14], %29 {strides = array<i32>} : memref<1x1x128xf32, #tpu.memory_space<vmem>>, vector<1x1x128xf32>,
    return
  }
  func.func @transform_0(%arg0: i32, %arg1: memref<4xi32, #tpu.memory_space<smem>>) -> (i32, i32, i32) {
    %c0_i32 = arith.constant 0 : i32
    %c0_i32_0 = arith.constant 0 : i32
    %c0_i32_1 = arith.constant 0 : i32
    %c0_i32_2 = arith.constant 0 : i32
    return %c0_i32, %c0_i32_0, %c0_i32_1 : i32, i32, i32
  }
  func.func @transform_1(%arg0: i32, %arg1: memref<4xi32, #tpu.memory_space<smem>>) -> (i32, i32) {
    %c0_i32 = arith.constant 0 : i32
    %c0_i32_0 = arith.constant 0 : i32
    %c0_i32_1 = arith.constant 0 : i32
    return %c0_i32, %c0_i32_0 : i32, i32
  }
  func.func @transform_2(%arg0: i32, %arg1: memref<4xi32, #tpu.memory_space<smem>>) -> (i32, i32) {
    %c0_i32 = arith.constant 0 : i32
    %c0_i32_0 = arith.constant 0 : i32
    %c0_i32_1 = arith.constant 0 : i32
    return %c0_i32, %c0_i32_0 : i32, i32
  }
  func.func @transform_3(%arg0: i32, %arg1: memref<4xi32, #tpu.memory_space<smem>>) -> (i32, i32) {
    %c0_i32 = arith.constant 0 : i32
    %c0_i32_0 = arith.constant 0 : i32
    %c0_i32_1 = arith.constant 0 : i32
    return %c0_i32, %c0_i32_0 : i32, i32
  }
  func.func @transform_4(%arg0: i32, %arg1: memref<4xi32, #tpu.memory_space<smem>>) -> (i32, i32, i32) {
    %c0_i32 = arith.constant 0 : i32
    %c0_i32_0 = arith.constant 0 : i32
    %c0_i32_1 = arith.constant 0 : i32
    return %arg0, %c0_i32, %c0_i32_0 : i32, i32, i32
  }
  func.func @transform_5(%arg0: i32, %arg1: memref<4xi32, #tpu.memory_space<smem>>) -> (i32, i32) {
    %c0_i32 = arith.constant 0 : i32
    %c0_i32_0 = arith.constant 0 : i32
    %c0_i32_1 = arith.constant 0 : i32
    return %c0_i32, %c0_i32_0 : i32, i32
  }
}

</mosaic_0001>

<bundles_post_ra>
// kernel: tpu_custom_call.1
= control target key start
LH: loop header
LB: loop body
LE: loop exit
PB: predicated region body
PF: predicated region fallthrough
CT: control target
= control target key end

     0   :  { %s726_s24 = smov [#allocation3]   ;;  %s909_s0 = inlined_call_operand.hbm [shape: s32[4], index: 0, kind: input, shape index: {}]   ;;  %s910_s1 = inlined_call_operand.hbm [shape: f32[57,1,256], index: 1, kind: input, shape index: {}]   ;;  %s911_s2 = inlined_call_operand.hbm [shape: f32[128,256], index: 2, kind: input, shape index: {}]   ;;  %s912_s3 = inlined_call_operand.vmem [shape: f32[1,256], index: 3, kind: input, shape index: {}]   ;;  %s913_s4 = inlined_call_operand.vmem [shape: f32[1,128], index: 4, kind: input, shape index: {}]   ;;  %s914_s5 = inlined_call_operand.hbm [shape: f32[4,1,128], index: 5, kind: output, shape index: {0}]   ;;  %s915_s6 = inlined_call_operand.hbm [shape: f32[1,128], index: 6, kind: output, shape index: {1}]  }
   0x1   :  { %s13_s23 = sshll.u32 %s909_s0, 4  ;;  %s14_s23 = int_to_ptr.hbm [resolvable:$true] %s13_s23 }
   0x2   :  { %16 = dma.hbm_to_smem %s14_s23, 16, %s726_s24, [#allocation2] }
   0x3   :  { %692 = dma.done.wait [#allocation2], 16 }
   0x4   :  { %693 = vsyncadd [#allocation2], 4294967280 }
   0x5   :  { %19 = sfence }
   0x6   :  { %20 = vsyncpa [#allocation5], 0 }
   0x7   :  { %21 = vsyncpa [#allocation8], 0 }
   0x8   :  { %22 = vsyncpa [#allocation6], 0 }
   0x9   :  { %24 = vsyncpa [#allocation6 + $0x1], 0 }
   0xa   :  { %25 = vsyncpa [#allocation11], 0  ;;  %s772_s25 = smov 0   ;;  %s774_s26 = smov 0  }
   0xb   :  { %s776_s27 = smov 0   ;;  %s778_s28 = smov 0  }
   0xc LB: > { %s793_s0 = sadd.s32 4294967295, %s724_s28   ;;  %s459_s29 = sadd.s32 4294967294, %s724_s28   ;;  %s724_s28 = sphi %s778_s28, %s922_s28   ;;  %s720_s27 = sphi %s776_s27, %s921_s27   ;;  %s716_s26 = sphi %s774_s26, %s920_s26   ;;  %s712_s25 = sphi %s772_s25, %s919_s25  }
   0xd   : > { %s797_s30 = sadd.s32 1, %s724_s28   ;;  %s122_s7 = sadd.s32 1, %s720_s27 }
   0xe   : > { %s119_s8 = ssub.s32 %s724_s28, %s797_s30  ;;  %p132_p0 = scmp.ne.s32.totalorder %s720_s27, %s716_s26 }
   0xf   : > { %p120_p1 = scmp.eq.s32.totalorder %s119_s8, 0  ;;  %p133_p2 = scmp.eq.s32.totalorder %s793_s0, 3 }
  0x10   : > { %p138_p3 = scmp.ne.s32.totalorder %s716_s26, %s712_s25  ;;  %p139_p4 = scmp.eq.s32.totalorder %s459_s29, 3 }
  0x11   : > { %s808_s9 = scalar_select %p120_p1, %s720_s27, %s122_s7  }
  0x12   : > { %p812_p5 = por %p133_p2, %p132_p0  ;;  %p816_p6 = por %p139_p4, %p138_p3 }
  0x13   : > { %p460_p7 = scmp.ge.s32.totalorder %s724_s28, 1  ;;  %p167_p8 = scmp.lt.s32.totalorder %s724_s28, 5 }
  0x14   : > { %p461_p9 = scmp.ne.s32.totalorder %s793_s0, 0  ;;  %p497_p10 = scmp.eq.s32.totalorder %s793_s0, 0 }
  0x15   : > { %p824_p11 = pnand %p460_p7, %p167_p8  ;;  %s178_s15 = sshll.u32 %s910_s1, 4  ;;  %s179_s15 = int_to_ptr.hbm [resolvable:$true] %s178_s15 }
  0x16   : > { %s727_s16 = smov [#allocation4]   ;;  %s192_s20 = sshll.u32 %s911_s2, 4  ;;  %s193_s20 = int_to_ptr.hbm [resolvable:$true] %s192_s20 }
  0x17   : > { %p486_p12 = pneg %p824_p11  ;;  %s180_s17 = sshll.u32 %s727_s16, 4  ;;  %s181_s17 = int_to_ptr.vmem [resolvable:$true] %s180_s17 }
  0x18   : > { %s728_s21 = smov 32   ;;  %s729_s22 = smov 2  }
  0x19   : > { %p487_p13 = pnand %p497_p10, %p486_p12  ;;  %s730_s23 = smov [#allocation7]  }
  0x1a   : > { %s194_s24 = sshll.u32 %s730_s23, 4  ;;  %s731_s29 = smov 256   ;;  %s195_s24 = int_to_ptr.vmem [resolvable:$true] %s194_s24 }
  0x1b   : > { %489 = dma.hbm_to_vmem [thread:$0]  (!%p487_p13), %s179_s15, 1824, %s181_s17, [#allocation5], %s728_s21, %s728_s21, %s729_s22  }
  0x1c   : > { %s732_s7 = smov 16   ;;  %216 = sbr.rel (%p824_p11) target bundleno = 471 (0x1d7), region = 36 }
  0x1d   : > { %492 = dma.hbm_to_vmem [thread:$0]  (!%p487_p13), %s193_s20, 4096, %s195_s24, [#allocation8], %s731_s29, %s731_s29, %s732_s7  }
  0x21   : > { %695 = dma.done.wait (%p497_p10), [#allocation5], 1824  }
  0x22   : > { %697 = vsyncadd (%p497_p10), [#allocation5], 4294965472 }
  0x23   : > { %699 = dma.done.wait (%p497_p10), [#allocation8], 4096  }
  0x24   : > { %701 = vsyncadd (%p497_p10), [#allocation8], 4294963200  ;;  %s240_s8 = sand.u32 1, %s716_s26   ;;  %247 = sbr.rel (%p461_p9) target bundleno = 43 (0x2b), region = 48 }
  0x25   : > { %s851_s13 = scalar_lea.vmem [#allocation9], %s240_s8 }
  0x29   : > { %v248_v0 = vld [vmem:[%s913_s4] sm:$0x1] }
  0x2a   : > { %249 = vst [vmem:[#allocation10] sm:$0x1] %v248_v0 }
  0x2b PF: > { %v286_v1 = vld [vmem:[#allocation7 + $0xf8] sm:$0xff]  ;;  %v285_v2 = vld [vmem:[#allocation7 + $0xf0] sm:$0xff]  ;;  %v284_v3 = vld [vmem:[#allocation7 + $0xe8] sm:$0xff]  ;;  %s251_s15 = sld [smem:[#allocation3 + %s793_s0]]  ;;  %vm330_vm0 = vcmask 1040384   ;;  %s733_s20 = smov [#allocation10]  }
  0x2c   : > { %307 = vmatpush.msra.mxu1 %v286_v1  ;;  %287 = vmatpush.msra.mxu0 %v285_v2  ;;  %v283_v4 = vld [vmem:[#allocation7 + $0xe0] sm:$0xff]  ;;  %v282_v5 = vld [vmem:[#allocation7 + $0xd8] sm:$0xff]  ;;  %v281_v6 = vld [vmem:[#allocation7 + $0xd0] sm:$0xff]  ;;  %s378_s21 = sshll.u32 %s733_s20, 4  ;;  %s380_s24 = sshll.u32 %s915_s6, 4  ;;  %s379_s21 = int_to_ptr.vmem [resolvable:$true] %s378_s21  ;;  %s381_s24 = int_to_ptr.hbm [resolvable:$true] %s380_s24 }
  0x2d   : > { %v280_v7 = vld [vmem:[#allocation7 + $0xc8] sm:$0xff]  ;;  %v279_v8 = vld [vmem:[#allocation7 + $0xc0] sm:$0xff]  ;;  %v278_v9 = vld [vmem:[#allocation7 + $0xb8] sm:$0xff]  ;;  %s364_s12 = scalar_lea.hbm %s914_s5, %s793_s0  ;;  %s366_s14 = sshll.u32 %s851_s13, 4  ;;  %s367_s14 = int_to_ptr.vmem [resolvable:$true] %s366_s14 }
  0x2e   : > { %308 = vmatpush.msra.mxu1 %v284_v3  ;;  %288 = vmatpush.msra.mxu0 %v283_v4  ;;  %v277_v10 = vld [vmem:[#allocation7 + $0xb0] sm:$0xff]  ;;  %v276_v11 = vld [vmem:[#allocation7 + $0xa8] sm:$0xff]  ;;  %v275_v12 = vld [vmem:[#allocation7 + $0xa0] sm:$0xff] }
  0x2f   : > { %v274_v13 = vld [vmem:[#allocation7 + $0x98] sm:$0xff]  ;;  %v273_v14 = vld [vmem:[#allocation7 + $0x90] sm:$0xff]  ;;  %v272_v15 = vld [vmem:[#allocation7 + $0x88] sm:$0xff] }
  0x30   : > { %309 = vmatpush.msra.mxu1 %v282_v5  ;;  %289 = vmatpush.msra.mxu0 %v281_v6  ;;  %v271_v16 = vld [vmem:[#allocation7 + $0x80] sm:$0xff]  ;;  %v270_v17 = vld [vmem:[#allocation7 + $0x78] sm:$0xff]  ;;  %v269_v18 = vld [vmem:[#allocation7 + $0x70] sm:$0xff] }
  0x31   : > { %v268_v19 = vld [vmem:[#allocation7 + $0x68] sm:$0xff]  ;;  %v267_v20 = vld [vmem:[#allocation7 + $0x60] sm:$0xff]  ;;  %v266_v21 = vld [vmem:[#allocation7 + $0x58] sm:$0xff]  ;;  %s467_s16 = sshll.u32 %s251_s15, 1  ;;  %s368_s15 = sshll.u32 %s364_s12, 4  ;;  %s369_s15 = int_to_ptr.hbm [resolvable:$true] %s368_s15 }
  0x32   : > { %310 = vmatpush.msra.mxu1 %v280_v7  ;;  %290 = vmatpush.msra.mxu0 %v279_v8  ;;  %v265_v22 = vld [vmem:[#allocation7 + $0x50] sm:$0xff]  ;;  %v264_v23 = vld [vmem:[#allocation7 + $0x48] sm:$0xff]  ;;  %v263_v24 = vld [vmem:[#allocation7 + $0x40] sm:$0xff]  ;;  %s253_s17 = scalar_lea.vmem [#allocation4], %s467_s16  ;;  %s356_s16 = scalar_lea.sflag [#allocation6], %s240_s8 }
  0x33   : > { %v262_v25 = vld [vmem:[#allocation7 + $0x38] sm:$0xff]  ;;  %v261_v26 = vld [vmem:[#allocation7 + $0x30] sm:$0xff]  ;;  %v260_v27 = vld [vmem:[#allocation7 + $0x28] sm:$0xff] }
  0x34   : > { %311 = vmatpush.msra.mxu1 %v278_v9  ;;  %291 = vmatpush.msra.mxu0 %v277_v10  ;;  %v259_v28 = vld [vmem:[#allocation7 + $0x20] sm:$0xff]  ;;  %v258_v29 = vld [vmem:[#allocation7 + $0x18] sm:$0xff]  ;;  %v257_v30 = vld [vmem:[#allocation7 + $0x10] sm:$0xff] }
  0x35   : > { %v256_v31 = vld [vmem:[#allocation7 + $0x8] sm:$0xff]  ;;  %v255_v32 = vld [vmem:[#allocation7] sm:$0xff] }
  0x36   : > { %312 = vmatpush.msra.mxu1 %v276_v11  ;;  %292 = vmatpush.msra.mxu0 %v275_v12  ;;  %v250_v33 = vld [vmem:[#allocation10] sm:$0x1]  ;;  %v254_v37 = vld [vmem:[%s253_s17] sm:$0x3]  ;;  %s662_s17 = sshra.s32 %s369_s15, 4  ;;  %s663_s17 = int_to_ptr.hbm [resolvable:$true] %s662_s17 }
  0x37   : > { %v334_v39 = vld [vmem:[%s912_s3] sm:$0x3]  ;;  %s664_s18 = scalar_lea.hbm %s663_s17, 1  ;;  %p669_p4 = scmp.lt.s32.totalorder %s663_s17, %s914_s5 }
  0x38   : > { %313 = vmatpush.msra.mxu1 %v274_v13  ;;  %293 = vmatpush.msra.mxu0 %v273_v14  ;;  %p665_p0 = scmp.ne.s32.totalorder %s663_s17, %s664_s18 }
  0x3a   : > { %314 = vmatpush.msra.mxu1 %v272_v15  ;;  %294 = vmatpush.msra.mxu0 %v271_v16  ;;  %p666_p1 = pnand %p665_p0, %p812_p5 }
  0x3c   : > { %315 = vmatpush.msra.mxu1 %v270_v17  ;;  %295 = vmatpush.msra.mxu0 %v269_v18  ;;  %p667_p3 = pneg %p666_p1 }
  0x3e   : > { %316 = vmatpush.msra.mxu1 %v268_v19  ;;  %296 = vmatpush.msra.mxu0 %v267_v20 }
  0x40   : > { %317 = vmatpush.msra.mxu1 %v266_v21  ;;  %297 = vmatpush.msra.mxu0 %v265_v22 }
  0x42   : > { %318 = vmatpush.msra.mxu1 %v264_v23  ;;  %298 = vmatpush.msra.mxu0 %v263_v24 }
  0x44   : > { %319 = vmatpush.msra.mxu1 %v262_v25  ;;  %299 = vmatpush.msra.mxu0 %v261_v26 }
  0x46   : > { %320 = vmatpush.msra.mxu1 %v260_v27  ;;  %300 = vmatpush.msra.mxu0 %v259_v28 }
  0x48   : > { %321 = vmatpush.msra.mxu1 %v258_v29  ;;  %301 = vmatpush.msra.mxu0 %v257_v30 }
  0x4a   : > { %322 = vmatpush.msra.mxu1 %v256_v31  ;;  %302 = vmatpush.msra.mxu0 %v255_v32 }
  0x4b   : > { %323 = vmatmul.f32.vlgmr.msra.gmra.mxu1 %v250_v33  ;;  %303 = vmatmul.f32.vlgmr.msra.gmra.mxu0 %v250_v33 }
  0xc8   : > { %v324_v34 = vpop.f32.mrf.mxu1  ;;  %v304_v35 = vpop.f32.mrf.mxu0 }
  0xc9   : > { %v329_v36 = vrot.slane %v324_v34, 7 }
  0xcb   : > { %v331_v38 = vsel %vm330_vm0, %v304_v35, %v329_v36 }
  0xcc   : > { %v333_v40 = vadd.f32 %v331_v38, %v254_v37 }
  0xce   : > { %v335_v41 = vadd.f32 %v334_v39, %v333_v40 }
  0xd0   : > { %336 = vst [vmem:[#allocation10] sm:$0x1] %v335_v41  ;;  %v338_v42 = vperm.slane %v335_v41, 1  ;;  %v343_v44 = vrot.slane %v335_v41, 1 }
  0xd1   : > { %482 = dma.vmem_to_hbm [thread:$0]  (%p133_p2), %s379_s21, 16, %s381_s24, [#allocation11]  }
  0xd2   : > { %v340_v43 = vsel %vm330_vm0, %v338_v42, -inf  ;;  %s668_s21 = scalar_lea.hbm %s914_s5, 4 }
  0xd3   : > { %341 = vmax.xlane.f32.xlu0 %v340_v43  ;;  %p670_p7 = scmp.lt.s32.totalorder %s668_s21, %s664_s18 }
  0xd5   : > { %p671_p8 = por %p670_p7, %p669_p4 }
  0xd7   : > { %p672_p9 = pnand %p671_p8, %p667_p3 }
 0x146   : > { %v342_v45 = vpop.xlane.xlu0 %341 }
 0x147   : > { %v345_v46 = vsub.f32 %v343_v44, %v342_v45 }
 0x149   : > { %v346_v47 = vmul.f32 1.442695, %v345_v46 }
 0x14b   : > { %544 = vpow2.f32 %v346_v47 }
 0x151   : > { %v545_v48 = vpop.eup %544 }
 0x152   : > { %v348_v49 = vsel %vm330_vm0, %v545_v48, 0.0 }
 0x153   : > { %349 = vadd.xlane.f32.xlu0 %v348_v49 }
 0x1c6   : > { %v350_v50 = vpop.xlane.xlu0 %349 }
 0x1c7   : > { %546 = vlog2.f32 %v350_v50 }
 0x1cd   : > { %v547_v51 = vpop.eup %546 }
 0x1ce   : > { %v352_v52 = vmul.f32 0.6931472, %v547_v51 }
 0x1d0   : > { %v353_v53 = vsub.f32 %v345_v46, %v352_v52 }
 0x1d2   : > { %354 = vst [vmem:[%s851_s13] sm:$0x1] %v353_v53 }
 0x1d3   : > { %675 = shalt.err (!%p672_p9)
}
 0x1d4   : > { %480 = dma.vmem_to_hbm [thread:$0]  (%p812_p5), %s367_s14, 16, %s369_s15, %s356_s16  }
 0x1d5   : > { %703 = dma.done.wait (%p133_p2), [#allocation11], 16  }
 0x1d6   : > { %705 = vsyncadd (%p133_p2), [#allocation11], 4294967280 }
 0x1d7 PF: > { %p503_p10 = scmp.ge.s32.totalorder %s724_s28, 2  ;;  %s397_s8 = sand.u32 1, %s712_s25  }
 0x1d8   : > { %s398_s13 = scalar_lea.sflag [#allocation6], %s397_s8 }
 0x1d9   : > { %p494_p11 = pnand %p503_p10, %p816_p6 }
 0x1db   : > { %p495_p12 = pneg %p494_p11 }
 0x1dd   : > { %707 = dma.done.wait (%p495_p12), %s398_s13, 16  }
 0x1de   : > { %709 = vsyncadd (%p495_p12), %s398_s13, 4294967280  ;;  %p28_p5 = scmp.ge.s32.totalorder %s797_s30, 6   ;;  %s919_s25 = smov %s716_s26 }
 0x1df   : > { %s920_s26 = smov %s720_s27  ;;  %s921_s27 = smov %s808_s9 }
 0x1e0   : > { %s922_s28 = smov %s797_s30  ;;  %30 = sbr.rel (!%p28_p5) target bundleno = 12 (0xc), region = 90 }
 0x1e5   :  { %403 = vsyncpa [#allocation5], 1 }
 0x1e6   :  { %405 = vsyncpa [#allocation5 + $0x1], 1 }
 0x1e7   :  { %406 = vsyncpa [#allocation8], 1 }
 0x1e8   :  { %407 = vsyncpa [#allocation6], 1 }
 0x1e9   :  { %409 = vsyncpa [#allocation6 + $0x1], 1 }
 0x1ea   :  { %410 = vsyncpa [#allocation11], 1 }

</bundles_post_ra>
